<compile_context>
chip_gen: v7x
topology: tpu7x:2x2x1
jax: 0.10.0
libtpu: 0.0.40
codegen_flags: <defaults>
</compile_context>

<pallas_src>
import functools

import jax
import jax.numpy as jnp
import numpy as np
from jax import lax
from jax.experimental import pallas as pl
from jax.experimental.pallas import tpu as pltpu

EPS = 1e-5      # PyTorch BatchNorm1d default eps
LANE = 128      # TPU lane width
SUBLANE = 8     # TPU sublane width (f32)


def _round_up(n, m):
    return ((n + m - 1) // m) * m


def _pad2(x, rows, cols):
    """Zero-pad a 2-D array up to (rows, cols)."""
    return jnp.pad(x, ((0, rows - x.shape[0]), (0, cols - x.shape[1])))


# ---------------------------------------------------------------------------
# Fused per-layer kernel:
#   all relation GraphConvs + per-dst-type sum aggregation + MLP/BN head
# ---------------------------------------------------------------------------
def _fused_layer_kernel(agg_then_matmul,
                        src_ids, dst_ids, firsts, lasts, nvalid,    # SMEM scalars
                        adj_ref, x_ref, wc_ref, bc_ref,             # per-relation conv
                        w1_ref, b1_ref, g_ref, beta_ref, w2_ref, b2_ref,  # head
                        out_ref, acc_ref):
    r = pl.program_id(0)
    a = adj_ref[0]                     # (Np, Np)  normalized adjacency (dst, src)
    x = x_ref[0]                       # (Np, Fi)  src-type features
    w = wc_ref[0]                      # (Fi, Fh)  relation weight
    b = bc_ref[0]                      # (1,  Fh)  relation bias

    if agg_then_matmul:                # (A @ X) @ W   (DGL: in_feats < out_feats)
        msg = jnp.dot(jnp.dot(a, x, preferred_element_type=jnp.float32), w,
                      preferred_element_type=jnp.float32)
    else:                              # A @ (X @ W)   (DGL: in_feats >= out_feats)
        msg = jnp.dot(a, jnp.dot(x, w, preferred_element_type=jnp.float32),
                      preferred_element_type=jnp.float32)
    msg = msg + b

    # HeteroGraphConv(aggregate='sum'): accumulate per destination node type.
    @pl.when(firsts[r] == 1)
    def _():
        acc_ref[...] = msg

    @pl.when(firsts[r] == 0)
    def _():
        acc_ref[...] = acc_ref[...] + msg

    # Last relation of this destination group: fused MLP/BN head, then emit.
    @pl.when(lasts[r] == 1)
    def _():
        n = nvalid[r]                                           # valid rows of this type
        h = jnp.dot(acc_ref[...], w1_ref[...],
                    preferred_element_type=jnp.float32) + b1_ref[...]
        h = jnp.maximum(h, 0.0)                                 # Linear + ReLU
        rows = lax.broadcasted_iota(jnp.int32, h.shape, 0)
        mask = (rows < n).astype(jnp.float32)                   # ignore padded rows
        cnt = n.astype(jnp.float32)
        mean = jnp.sum(h * mask, axis=0, keepdims=True) / cnt
        cen = (h - mean) * mask
        var = jnp.sum(cen * cen, axis=0, keepdims=True) / cnt   # biased (training BN)
        hn = (h - mean) * lax.rsqrt(var + EPS)
        hn = hn * g_ref[...] + beta_ref[...]                    # BatchNorm1d affine
        o = jnp.dot(hn, w2_ref[...],
                    preferred_element_type=jnp.float32) + b2_ref[...]
        out_ref[0] = jnp.maximum(o, 0.0)                        # Linear + ReLU


def fused_hetero_layer(adj_stack, x_stack, wc_stack, bc_stack, head,
                       src_ids, dst_ids, firsts, lasts, nvalid_rel,
                       *, agg_then_matmul):
    n_rels, n_pad, _ = adj_stack.shape
    n_types, _, f_in = x_stack.shape
    f_hid = wc_stack.shape[2]
    w1, b1, g, bt, w2, b2 = head
    h_dim = w1.shape[1]
    f_out = w2.shape[1]

    kernel = functools.partial(_fused_layer_kernel, agg_then_matmul)

    grid_spec = pltpu.PrefetchScalarGridSpec(
        num_scalar_prefetch=5,
        grid=(n_rels,),
        in_specs=[
            # per-relation adjacency / weight / bias
            pl.BlockSpec((1, n_pad, n_pad), lambda r, s, d, f, l, nv: (r, 0, 0)),
            # src-type features picked via scalar-prefetched src id
            pl.BlockSpec((1, n_pad, f_in), lambda r, s, d, f, l, nv: (s[r], 0, 0)),
            pl.BlockSpec((1, f_in, f_hid), lambda r, s, d, f, l, nv: (r, 0, 0)),
            pl.BlockSpec((1, 1, f_hid), lambda r, s, d, f, l, nv: (r, 0, 0)),
            # shared MLP/BN head params: resident (fetched once, index constant)
            pl.BlockSpec((f_hid, h_dim), lambda r, *_: (0, 0)),
            pl.BlockSpec((1, h_dim), lambda r, *_: (0, 0)),
            pl.BlockSpec((1, h_dim), lambda r, *_: (0, 0)),
            pl.BlockSpec((1, h_dim), lambda r, *_: (0, 0)),
            pl.BlockSpec((h_dim, f_out), lambda r, *_: (0, 0)),
            pl.BlockSpec((1, f_out), lambda r, *_: (0, 0)),
        ],
        out_specs=pl.BlockSpec((1, n_pad, f_out),
                               lambda r, s, d, f, l, nv: (d[r], 0, 0)),
        scratch_shapes=[pltpu.VMEM((n_pad, f_hid), jnp.float32)],
    )
    # TODO(synk): add an outer "parallel" grid axis over dst row tiles for v7x's
    # two TensorCores once graphs are large enough to tile.
    return pl.pallas_call(
        kernel,
        out_shape=jax.ShapeDtypeStruct((n_types, n_pad, f_out), jnp.float32),
        grid_spec=grid_spec,
        compiler_params=pltpu.CompilerParams(
            dimension_semantics=("arbitrary",)),   # relation axis carries the accumulator
    )(src_ids, dst_ids, firsts, lasts, nvalid_rel,
      adj_stack, x_stack, wc_stack, bc_stack, w1, b1, g, bt, w2, b2)


# ---------------------------------------------------------------------------
# Host-side glue: graph normalization, padding, scheduling, slicing
# ---------------------------------------------------------------------------
def normalize_adj(adj):
    # DGL GraphConv norm='both': D_dst^{-1/2} A D_src^{-1/2}; degrees clamped >= 1.
    deg_out = jnp.clip(adj.sum(axis=0), 1.0, None)   # src out-degree (n_src,)
    deg_in = jnp.clip(adj.sum(axis=1), 1.0, None)    # dst in-degree  (n_dst,)
    return adj * (deg_in ** -0.5)[:, None] * (deg_out ** -0.5)[None, :]


def hgcn_forward(graph, inputs, params):
    """graph: {rel: (src_type, dst_type, adj_norm of shape (n_dst, n_src))}."""
    type_order = sorted(inputs)
    t_idx = {t: i for i, t in enumerate(type_order)}
    counts = {t: inputs[t].shape[0] for t in type_order}
    n_pad = _round_up(max(counts.values()), SUBLANE)

    # Relations grouped by destination type -> contiguous accumulator runs.
    rel_sched = [r for t in type_order for r in sorted(graph) if graph[r][1] == t]
    dsts = [graph[r][1] for r in rel_sched]
    src_ids = jnp.array([t_idx[graph[r][0]] for r in rel_sched], jnp.int32)
    dst_ids = jnp.array([t_idx[d] for d in dsts], jnp.int32)
    firsts = jnp.array(
        [1 if i == 0 or dsts[i] != dsts[i - 1] else 0 for i in range(len(dsts))],
        jnp.int32)
    lasts = jnp.array(
        [1 if i == len(dsts) - 1 or dsts[i] != dsts[i + 1] else 0
         for i in range(len(dsts))], jnp.int32)
    nvalid_rel = jnp.array([counts[d] for d in dsts], jnp.int32)
    sched = (src_ids, dst_ids, firsts, lasts, nvalid_rel)

    # Padded adjacency stack (shared by both layers).
    adj_stack = jnp.stack([_pad2(graph[r][2], n_pad, n_pad) for r in rel_sched])

    in_feats = inputs[type_order[0]].shape[1]
    hid = params["conv1"][rel_sched[0]][0].shape[1]
    out_feats = params["conv2"][rel_sched[0]][0].shape[1]
    f_in_p = _round_up(in_feats, LANE)
    hid_p = _round_up(hid, LANE)
    out_p = _round_up(out_feats, LANE)

    def pad_conv(conv, fi_p, fo_p):
        ws = jnp.stack([_pad2(conv[r][0], fi_p, fo_p) for r in rel_sched])
        bs = jnp.stack([_pad2(conv[r][1][None, :], 1, fo_p) for r in rel_sched])
        return ws, bs

    def pad_head(head, fi_p, fo_p):
        w1, b1, g, bt, w2, b2 = head
        h_p = _round_up(w1.shape[1], LANE)
        return (_pad2(w1, fi_p, h_p), _pad2(b1[None, :], 1, h_p),
                _pad2(g[None, :], 1, h_p), _pad2(bt[None, :], 1, h_p),
                _pad2(w2, h_p, fo_p), _pad2(b2[None, :], 1, fo_p))

    # Layer 1: conv1 + sum aggregate + sequential1 — one launch.
    x_stack = jnp.stack([_pad2(inputs[t], n_pad, f_in_p) for t in type_order])
    wc1, bc1 = pad_conv(params["conv1"], f_in_p, hid_p)
    h1 = fused_hetero_layer(adj_stack, x_stack, wc1, bc1,
                            pad_head(params["seq1"], hid_p, hid_p), *sched,
                            agg_then_matmul=in_feats < hid)

    # Layer 2: conv2 + sum aggregate + sequential2 — one launch.
    wc2, bc2 = pad_conv(params["conv2"], hid_p, out_p)
    h2 = fused_hetero_layer(adj_stack, h1, wc2, bc2,
                            pad_head(params["seq2"], out_p, out_p), *sched,
                            agg_then_matmul=hid < out_feats)

    dst_types = sorted({graph[r][1] for r in graph})
    return {t: h2[t_idx[t], :counts[t], :out_feats] for t in dst_types}


# ---------------------------------------------------------------------------
# Pure-JAX reference (unpadded, same math) for a sanity check
# ---------------------------------------------------------------------------
def _ref_graphconv(a, x, w, b):
    return a @ (x @ w) + b


def _ref_mlp(x, w1, b1, g, bt, w2, b2):
    h = jnp.maximum(x @ w1 + b1, 0.0)
    m = h.mean(0, keepdims=True)
    v = ((h - m) ** 2).mean(0, keepdims=True)
    h = (h - m) * lax.rsqrt(v + EPS) * g + bt
    return jnp.maximum(h @ w2 + b2, 0.0)


def _ref_forward(graph, inputs, params):
    def het(feats, p):
        o = {}
        for rel, (s, d, a) in graph.items():
            m = _ref_graphconv(a, feats[s], *p[rel])
            o[d] = m if d not in o else o[d] + m
        return o

    h = het(inputs, params["conv1"])
    h = {k: _ref_mlp(v, *params["seq1"]) for k, v in h.items()}
    h = het(h, params["conv2"])
    return {k: _ref_mlp(v, *params["seq2"]) for k, v in h.items()}


# ---------------------------------------------------------------------------
if __name__ == "__main__":
    key = jax.random.PRNGKey(0)
    keys = iter(jax.random.split(key, 64))

    # hid_feats=100 and out_feats=4 are forced by sequential1 / sequential2.
    in_feats, hid_feats, out_feats = 16, 100, 4
    n_a, n_b = 8, 12  # two node types: 'A' (8 nodes), 'B' (12 nodes)

    # canonical etypes: rel -> (src_type, dst_type, adj_shape=(n_dst, n_src))
    rel_defs = {
        "r0": ("A", "B", (n_b, n_a)),
        "r1": ("A", "A", (n_a, n_a)),
        "r2": ("B", "A", (n_a, n_b)),
    }
    graph = {}
    for rel, (src, dst, shape) in rel_defs.items():
        adj = (jax.random.uniform(next(keys), shape) < 0.4).astype(jnp.float32)
        graph[rel] = (src, dst, normalize_adj(adj))

    def lin(k, fi, fo, scale=0.1):
        kw, kb = jax.random.split(k)
        return (scale * jax.random.normal(kw, (fi, fo), jnp.float32),
                scale * jax.random.normal(kb, (fo,), jnp.float32))

    params = {
        "conv1": {rel: lin(next(keys), in_feats, hid_feats) for rel in rel_defs},
        "conv2": {rel: lin(next(keys), hid_feats, out_feats) for rel in rel_defs},
    }
    w1, b1 = lin(next(keys), 100, 128)
    w2, b2 = lin(next(keys), 128, 100)
    params["seq1"] = (w1, b1, jnp.ones((128,), jnp.float32),
                      jnp.zeros((128,), jnp.float32), w2, b2)
    w3, b3 = lin(next(keys), 4, 64)
    w4, b4 = lin(next(keys), 64, 4)
    params["seq2"] = (w3, b3, jnp.ones((64,), jnp.float32),
                      jnp.zeros((64,), jnp.float32), w4, b4)

    inputs = {
        "A": jax.random.normal(next(keys), (n_a, in_feats), jnp.float32),
        "B": jax.random.normal(next(keys), (n_b, in_feats), jnp.float32),
    }

    out = hgcn_forward(graph, inputs, params)
    out = {k: jax.block_until_ready(v) for k, v in out.items()}

    ref = _ref_forward(graph, inputs, params)
    for k in out:
        assert out[k].shape == (inputs[k].shape[0], out_feats), out[k].shape
        np.testing.assert_allclose(np.asarray(out[k]), np.asarray(ref[k]),
                                   rtol=1e-2, atol=1e-2)

    print("KERNEL_OK")
</pallas_src>

<mosaic_0001>
module attributes {stable_mosaic.version = 11 : i64} {
  func.func @_fused_layer_kernel(%arg0: i32, %arg1: memref<3xi32, #tpu.memory_space<smem>>, %arg2: memref<3xi32, #tpu.memory_space<smem>>, %arg3: memref<3xi32, #tpu.memory_space<smem>>, %arg4: memref<3xi32, #tpu.memory_space<smem>>, %arg5: memref<3xi32, #tpu.memory_space<smem>>, %arg6: memref<1x16x16xf32, #tpu.memory_space<vmem>>, %arg7: memref<1x16x128xf32, #tpu.memory_space<vmem>>, %arg8: memref<1x128x128xf32, #tpu.memory_space<vmem>>, %arg9: memref<1x1x128xf32, #tpu.memory_space<vmem>>, %arg10: memref<128x128xf32, #tpu.memory_space<vmem>>, %arg11: memref<1x128xf32, #tpu.memory_space<vmem>>, %arg12: memref<1x128xf32, #tpu.memory_space<vmem>>, %arg13: memref<1x128xf32, #tpu.memory_space<vmem>>, %arg14: memref<128x128xf32, #tpu.memory_space<vmem>>, %arg15: memref<1x128xf32, #tpu.memory_space<vmem>>, %arg16: memref<1x16x128xf32, #tpu.memory_space<vmem>>, %arg17: memref<16x128xf32, #tpu.memory_space<vmem>>) attributes {dimension_semantics = [#tpu.dimension_semantics<arbitrary>], iteration_bounds = array<i64: 3>, scalar_prefetch = 5 : i64, scratch_operands = 1 : i64, tpu.core_type = #tpu.core_type<tc>, window_params = [{transform_indices = @transform_0, window_bounds = array<i64: 1, 16, 16>}, {transform_indices = @transform_1, window_bounds = array<i64: 1, 16, 128>}, {transform_indices = @transform_2, window_bounds = array<i64: 1, 128, 128>}, {transform_indices = @transform_3, window_bounds = array<i64: 1, 1, 128>}, {pipeline_mode = #tpu.pipeline_mode<synchronous>, transform_indices = @transform_4, window_bounds = array<i64: 128, 128>}, {pipeline_mode = #tpu.pipeline_mode<synchronous>, transform_indices = @transform_5, window_bounds = array<i64: 1, 128>}, {pipeline_mode = #tpu.pipeline_mode<synchronous>, transform_indices = @transform_6, window_bounds = array<i64: 1, 128>}, {pipeline_mode = #tpu.pipeline_mode<synchronous>, transform_indices = @transform_7, window_bounds = array<i64: 1, 128>}, {pipeline_mode = #tpu.pipeline_mode<synchronous>, transform_indices = @transform_8, window_bounds = array<i64: 128, 128>}, {pipeline_mode = #tpu.pipeline_mode<synchronous>, transform_indices = @transform_9, window_bounds = array<i64: 1, 128>}, {transform_indices = @transform_10, window_bounds = array<i64: 1, 16, 128>}]} {
    %c0 = arith.constant 0 : index
    %c0_0 = arith.constant 0 : index
    %c0_1 = arith.constant 0 : index
    %0 = vector.load %arg6[%c0, %c0_0, %c0_1] : memref<1x16x16xf32, #tpu.memory_space<vmem>>, vector<1x16x16xf32>
    %1 = vector.shape_cast %0 : vector<1x16x16xf32> to vector<16x16xf32>
    %c0_2 = arith.constant 0 : index
    %c0_3 = arith.constant 0 : index
    %c0_4 = arith.constant 0 : index
    %2 = vector.load %arg7[%c0_2, %c0_3, %c0_4] : memref<1x16x128xf32, #tpu.memory_space<vmem>>, vector<1x16x128xf32>
    %3 = vector.shape_cast %2 : vector<1x16x128xf32> to vector<16x128xf32>
    %c0_5 = arith.constant 0 : index
    %c0_6 = arith.constant 0 : index
    %c0_7 = arith.constant 0 : index
    %4 = vector.load %arg8[%c0_5, %c0_6, %c0_7] : memref<1x128x128xf32, #tpu.memory_space<vmem>>, vector<1x128x128xf32>
    %5 = vector.shape_cast %4 : vector<1x128x128xf32> to vector<128x128xf32>
    %c0_8 = arith.constant 0 : index
    %c0_9 = arith.constant 0 : index
    %c0_10 = arith.constant 0 : index
    %6 = vector.load %arg9[%c0_8, %c0_9, %c0_10] : memref<1x1x128xf32, #tpu.memory_space<vmem>>, vector<1x1x128xf32>
    %7 = vector.shape_cast %6 : vector<1x1x128xf32> to vector<1x128xf32>
    %cst = arith.constant dense<0.000000e+00> : vector<16x128xf32>
    %8 = tpu.matmul %1, %3, %cst {dimension_numbers = #tpu.dot_dimension_numbers<[1], [0], [0], [1], [0, 0, 1, 1], [], []>} : vector<16x16xf32>, vector<16x128xf32>, vector<16x128xf32> -> vector<16x128xf32>
    %cst_11 = arith.constant dense<0.000000e+00> : vector<16x128xf32>
    %9 = tpu.matmul %8, %5, %cst_11 {dimension_numbers = #tpu.dot_dimension_numbers<[1], [0], [0], [1], [0, 0, 1, 1], [], []>} : vector<16x128xf32>, vector<128x128xf32>, vector<16x128xf32> -> vector<16x128xf32>
    %10 = vector.broadcast %7 : vector<1x128xf32> to vector<16x128xf32>
    %11 = arith.addf %9, %10 : vector<16x128xf32>
    %12 = arith.index_cast %arg0 : i32 to index
    %13 = memref.load %arg3[%12] : memref<3xi32, #tpu.memory_space<smem>>
    %c1_i32 = arith.constant 1 : i32
    %14 = arith.cmpi eq, %13, %c1_i32 : i32
    %15 = arith.extui %14 : i1 to i32
    %c0_i32 = arith.constant 0 : i32
    %16 = arith.cmpi ne, %15, %c0_i32 : i32
    scf.if %16 {
      %c0_16 = arith.constant 0 : index
      %c0_17 = arith.constant 0 : index
      %27 = vector.load %arg17[%c0_16, %c0_17] : memref<16x128xf32, #tpu.memory_space<vmem>>, vector<16x128xf32>
      tpu.vector_store %arg17[%c0_16, %c0_17], %11 {strides = array<i32>} : memref<16x128xf32, #tpu.memory_space<vmem>>, vector<16x128xf32>,
    } else {
    }
    %17 = arith.index_cast %arg0 : i32 to index
    %18 = memref.load %arg3[%17] : memref<3xi32, #tpu.memory_space<smem>>
    %c0_i32_12 = arith.constant 0 : i32
    %19 = arith.cmpi eq, %18, %c0_i32_12 : i32
    %20 = arith.extui %19 : i1 to i32
    %c0_i32_13 = arith.constant 0 : i32
    %21 = arith.cmpi ne, %20, %c0_i32_13 : i32
    scf.if %21 {
      %c0_16 = arith.constant 0 : index
      %c0_17 = arith.constant 0 : index
      %27 = vector.load %arg17[%c0_16, %c0_17] : memref<16x128xf32, #tpu.memory_space<vmem>>, vector<16x128xf32>
      %28 = arith.addf %27, %11 : vector<16x128xf32>
      %c0_18 = arith.constant 0 : index
      %c0_19 = arith.constant 0 : index
      %29 = vector.load %arg17[%c0_18, %c0_19] : memref<16x128xf32, #tpu.memory_space<vmem>>, vector<16x128xf32>
      tpu.vector_store %arg17[%c0_18, %c0_19], %28 {strides = array<i32>} : memref<16x128xf32, #tpu.memory_space<vmem>>, vector<16x128xf32>,
    } else {
    }
    %22 = arith.index_cast %arg0 : i32 to index
    %23 = memref.load %arg4[%22] : memref<3xi32, #tpu.memory_space<smem>>
    %c1_i32_14 = arith.constant 1 : i32
    %24 = arith.cmpi eq, %23, %c1_i32_14 : i32
    %25 = arith.extui %24 : i1 to i32
    %c0_i32_15 = arith.constant 0 : i32
    %26 = arith.cmpi ne, %25, %c0_i32_15 : i32
    scf.if %26 {
      %27 = arith.index_cast %arg0 : i32 to index
      %28 = memref.load %arg5[%27] : memref<3xi32, #tpu.memory_space<smem>>
      %c0_16 = arith.constant 0 : index
      %c0_17 = arith.constant 0 : index
      %29 = vector.load %arg17[%c0_16, %c0_17] : memref<16x128xf32, #tpu.memory_space<vmem>>, vector<16x128xf32>
      %c0_18 = arith.constant 0 : index
      %c0_19 = arith.constant 0 : index
      %30 = vector.load %arg10[%c0_18, %c0_19] : memref<128x128xf32, #tpu.memory_space<vmem>>, vector<128x128xf32>
      %cst_20 = arith.constant dense<0.000000e+00> : vector<16x128xf32>
      %31 = tpu.matmul %29, %30, %cst_20 {dimension_numbers = #tpu.dot_dimension_numbers<[1], [0], [0], [1], [0, 0, 1, 1], [], []>} : vector<16x128xf32>, vector<128x128xf32>, vector<16x128xf32> -> vector<16x128xf32>
      %c0_21 = arith.constant 0 : index
      %c0_22 = arith.constant 0 : index
      %32 = vector.load %arg11[%c0_21, %c0_22] : memref<1x128xf32, #tpu.memory_space<vmem>>, vector<1x128xf32>
      %33 = vector.broadcast %32 : vector<1x128xf32> to vector<16x128xf32>
      %34 = arith.addf %31, %33 : vector<16x128xf32>
      %cst_23 = arith.constant 0.000000e+00 : f32
      %35 = vector.broadcast %cst_23 : f32 to vector<16x128xf32>
      %36 = arith.maximumf %34, %35 : vector<16x128xf32>
      %37 = tpu.iota {dimensions = array<i32: 0>} : vector<16x128xi32>
      %38 = vector.broadcast %28 : i32 to vector<16x128xi32>
      %39 = arith.cmpi slt, %37, %38 : vector<16x128xi32>
      %40 = arith.extui %39 : vector<16x128xi1> to vector<16x128xi32>
      %41 = arith.sitofp %40 : vector<16x128xi32> to vector<16x128xf32>
      %42 = arith.sitofp %28 : i32 to f32
      %43 = arith.mulf %36, %41 : vector<16x128xf32>
      %cst_24 = arith.constant dense<0.000000e+00> : vector<128xf32>
      %44 = vector.multi_reduction <add>, %43, %cst_24 [0] : vector<16x128xf32> to vector<128xf32>
      %45 = vector.shape_cast %44 : vector<128xf32> to vector<1x128xf32>
      %46 = vector.broadcast %42 : f32 to vector<1x128xf32>
      %47 = arith.divf %45, %46 : vector<1x128xf32>
      %48 = vector.broadcast %47 : vector<1x128xf32> to vector<16x128xf32>
      %49 = arith.subf %36, %48 : vector<16x128xf32>
      %50 = arith.mulf %49, %41 : vector<16x128xf32>
      %51 = arith.mulf %50, %50 : vector<16x128xf32>
      %cst_25 = arith.constant dense<0.000000e+00> : vector<128xf32>
      %52 = vector.multi_reduction <add>, %51, %cst_25 [0] : vector<16x128xf32> to vector<128xf32>
      %53 = vector.shape_cast %52 : vector<128xf32> to vector<1x128xf32>
      %54 = vector.broadcast %42 : f32 to vector<1x128xf32>
      %55 = arith.divf %53, %54 : vector<1x128xf32>
      %56 = vector.broadcast %47 : vector<1x128xf32> to vector<16x128xf32>
      %57 = arith.subf %36, %56 : vector<16x128xf32>
      %cst_26 = arith.constant 9.99999974E-6 : f32
      %58 = vector.broadcast %cst_26 : f32 to vector<1x128xf32>
      %59 = arith.addf %55, %58 : vector<1x128xf32>
      %60 = math.rsqrt %59 : vector<1x128xf32>
      %61 = vector.broadcast %60 : vector<1x128xf32> to vector<16x128xf32>
      %62 = arith.mulf %57, %61 : vector<16x128xf32>
      %c0_27 = arith.constant 0 : index
      %c0_28 = arith.constant 0 : index
      %63 = vector.load %arg12[%c0_27, %c0_28] : memref<1x128xf32, #tpu.memory_space<vmem>>, vector<1x128xf32>
      %64 = vector.broadcast %63 : vector<1x128xf32> to vector<16x128xf32>
      %65 = arith.mulf %62, %64 : vector<16x128xf32>
      %c0_29 = arith.constant 0 : index
      %c0_30 = arith.constant 0 : index
      %66 = vector.load %arg13[%c0_29, %c0_30] : memref<1x128xf32, #tpu.memory_space<vmem>>, vector<1x128xf32>
      %67 = vector.broadcast %66 : vector<1x128xf32> to vector<16x128xf32>
      %68 = arith.addf %65, %67 : vector<16x128xf32>
      %c0_31 = arith.constant 0 : index
      %c0_32 = arith.constant 0 : index
      %69 = vector.load %arg14[%c0_31, %c0_32] : memref<128x128xf32, #tpu.memory_space<vmem>>, vector<128x128xf32>
      %cst_33 = arith.constant dense<0.000000e+00> : vector<16x128xf32>
      %70 = tpu.matmul %68, %69, %cst_33 {dimension_numbers = #tpu.dot_dimension_numbers<[1], [0], [0], [1], [0, 0, 1, 1], [], []>} : vector<16x128xf32>, vector<128x128xf32>, vector<16x128xf32> -> vector<16x128xf32>
      %c0_34 = arith.constant 0 : index
      %c0_35 = arith.constant 0 : index
      %71 = vector.load %arg15[%c0_34, %c0_35] : memref<1x128xf32, #tpu.memory_space<vmem>>, vector<1x128xf32>
      %72 = vector.broadcast %71 : vector<1x128xf32> to vector<16x128xf32>
      %73 = arith.addf %70, %72 : vector<16x128xf32>
      %cst_36 = arith.constant 0.000000e+00 : f32
      %74 = vector.broadcast %cst_36 : f32 to vector<16x128xf32>
      %75 = arith.maximumf %73, %74 : vector<16x128xf32>
      %c0_37 = arith.constant 0 : index
      %c0_38 = arith.constant 0 : index
      %c0_39 = arith.constant 0 : index
      %76 = vector.load %arg16[%c0_37, %c0_38, %c0_39] : memref<1x16x128xf32, #tpu.memory_space<vmem>>, vector<1x16x128xf32>
      %77 = vector.shape_cast %76 : vector<1x16x128xf32> to vector<16x128xf32>
      %78 = vector.shape_cast %75 : vector<16x128xf32> to vector<1x16x128xf32>
      tpu.vector_store %arg16[%c0_37, %c0_38, %c0_39], %78 {strides = array<i32>} : memref<1x16x128xf32, #tpu.memory_space<vmem>>, vector<1x16x128xf32>,
    } else {
    }
    return
  }
  func.func @transform_0(%arg0: i32, %arg1: memref<3xi32, #tpu.memory_space<smem>>, %arg2: memref<3xi32, #tpu.memory_space<smem>>, %arg3: memref<3xi32, #tpu.memory_space<smem>>, %arg4: memref<3xi32, #tpu.memory_space<smem>>, %arg5: memref<3xi32, #tpu.memory_space<smem>>) -> (i32, i32, i32) {
    %c0_i32 = arith.constant 0 : i32
    %c0_i32_0 = arith.constant 0 : i32
    %c0_i32_1 = arith.constant 0 : i32
    return %arg0, %c0_i32, %c0_i32_0 : i32, i32, i32
  }
  func.func @transform_1(%arg0: i32, %arg1: memref<3xi32, #tpu.memory_space<smem>>, %arg2: memref<3xi32, #tpu.memory_space<smem>>, %arg3: memref<3xi32, #tpu.memory_space<smem>>, %arg4: memref<3xi32, #tpu.memory_space<smem>>, %arg5: memref<3xi32, #tpu.memory_space<smem>>) -> (i32, i32, i32) {
    %0 = arith.index_cast %arg0 : i32 to index
    %1 = memref.load %arg1[%0] : memref<3xi32, #tpu.memory_space<smem>>
    %c0_i32 = arith.constant 0 : i32
    %c0_i32_0 = arith.constant 0 : i32
    %c0_i32_1 = arith.constant 0 : i32
    return %1, %c0_i32, %c0_i32_0 : i32, i32, i32
  }
  func.func @transform_2(%arg0: i32, %arg1: memref<3xi32, #tpu.memory_space<smem>>, %arg2: memref<3xi32, #tpu.memory_space<smem>>, %arg3: memref<3xi32, #tpu.memory_space<smem>>, %arg4: memref<3xi32, #tpu.memory_space<smem>>, %arg5: memref<3xi32, #tpu.memory_space<smem>>) -> (i32, i32, i32) {
    %c0_i32 = arith.constant 0 : i32
    %c0_i32_0 = arith.constant 0 : i32
    %c0_i32_1 = arith.constant 0 : i32
    return %arg0, %c0_i32, %c0_i32_0 : i32, i32, i32
  }
  func.func @transform_3(%arg0: i32, %arg1: memref<3xi32, #tpu.memory_space<smem>>, %arg2: memref<3xi32, #tpu.memory_space<smem>>, %arg3: memref<3xi32, #tpu.memory_space<smem>>, %arg4: memref<3xi32, #tpu.memory_space<smem>>, %arg5: memref<3xi32, #tpu.memory_space<smem>>) -> (i32, i32, i32) {
    %c0_i32 = arith.constant 0 : i32
    %c0_i32_0 = arith.constant 0 : i32
    %c0_i32_1 = arith.constant 0 : i32
    return %arg0, %c0_i32, %c0_i32_0 : i32, i32, i32
  }
  func.func @transform_4(%arg0: i32, %arg1: memref<3xi32, #tpu.memory_space<smem>>, %arg2: memref<3xi32, #tpu.memory_space<smem>>, %arg3: memref<3xi32, #tpu.memory_space<smem>>, %arg4: memref<3xi32, #tpu.memory_space<smem>>, %arg5: memref<3xi32, #tpu.memory_space<smem>>) -> (i32, i32) {
    %c0_i32 = arith.constant 0 : i32
    %c0_i32_0 = arith.constant 0 : i32
    %c0_i32_1 = arith.constant 0 : i32
    return %c0_i32, %c0_i32_0 : i32, i32
  }
  func.func @transform_5(%arg0: i32, %arg1: memref<3xi32, #tpu.memory_space<smem>>, %arg2: memref<3xi32, #tpu.memory_space<smem>>, %arg3: memref<3xi32, #tpu.memory_space<smem>>, %arg4: memref<3xi32, #tpu.memory_space<smem>>, %arg5: memref<3xi32, #tpu.memory_space<smem>>) -> (i32, i32) {
    %c0_i32 = arith.constant 0 : i32
    %c0_i32_0 = arith.constant 0 : i32
    %c0_i32_1 = arith.constant 0 : i32
    return %c0_i32, %c0_i32_0 : i32, i32
  }
  func.func @transform_6(%arg0: i32, %arg1: memref<3xi32, #tpu.memory_space<smem>>, %arg2: memref<3xi32, #tpu.memory_space<smem>>, %arg3: memref<3xi32, #tpu.memory_space<smem>>, %arg4: memref<3xi32, #tpu.memory_space<smem>>, %arg5: memref<3xi32, #tpu.memory_space<smem>>) -> (i32, i32) {
    %c0_i32 = arith.constant 0 : i32
    %c0_i32_0 = arith.constant 0 : i32
    %c0_i32_1 = arith.constant 0 : i32
    return %c0_i32, %c0_i32_0 : i32, i32
  }
  func.func @transform_7(%arg0: i32, %arg1: memref<3xi32, #tpu.memory_space<smem>>, %arg2: memref<3xi32, #tpu.memory_space<smem>>, %arg3: memref<3xi32, #tpu.memory_space<smem>>, %arg4: memref<3xi32, #tpu.memory_space<smem>>, %arg5: memref<3xi32, #tpu.memory_space<smem>>) -> (i32, i32) {
    %c0_i32 = arith.constant 0 : i32
    %c0_i32_0 = arith.constant 0 : i32
    %c0_i32_1 = arith.constant 0 : i32
    return %c0_i32, %c0_i32_0 : i32, i32
  }
  func.func @transform_8(%arg0: i32, %arg1: memref<3xi32, #tpu.memory_space<smem>>, %arg2: memref<3xi32, #tpu.memory_space<smem>>, %arg3: memref<3xi32, #tpu.memory_space<smem>>, %arg4: memref<3xi32, #tpu.memory_space<smem>>, %arg5: memref<3xi32, #tpu.memory_space<smem>>) -> (i32, i32) {
    %c0_i32 = arith.constant 0 : i32
    %c0_i32_0 = arith.constant 0 : i32
    %c0_i32_1 = arith.constant 0 : i32
    return %c0_i32, %c0_i32_0 : i32, i32
  }
  func.func @transform_9(%arg0: i32, %arg1: memref<3xi32, #tpu.memory_space<smem>>, %arg2: memref<3xi32, #tpu.memory_space<smem>>, %arg3: memref<3xi32, #tpu.memory_space<smem>>, %arg4: memref<3xi32, #tpu.memory_space<smem>>, %arg5: memref<3xi32, #tpu.memory_space<smem>>) -> (i32, i32) {
    %c0_i32 = arith.constant 0 : i32
    %c0_i32_0 = arith.constant 0 : i32
    %c0_i32_1 = arith.constant 0 : i32
    return %c0_i32, %c0_i32_0 : i32, i32
  }
  func.func @transform_10(%arg0: i32, %arg1: memref<3xi32, #tpu.memory_space<smem>>, %arg2: memref<3xi32, #tpu.memory_space<smem>>, %arg3: memref<3xi32, #tpu.memory_space<smem>>, %arg4: memref<3xi32, #tpu.memory_space<smem>>, %arg5: memref<3xi32, #tpu.memory_space<smem>>) -> (i32, i32, i32) {
    %0 = arith.index_cast %arg0 : i32 to index
    %1 = memref.load %arg2[%0] : memref<3xi32, #tpu.memory_space<smem>>
    %c0_i32 = arith.constant 0 : i32
    %c0_i32_0 = arith.constant 0 : i32
    %c0_i32_1 = arith.constant 0 : i32
    return %1, %c0_i32, %c0_i32_0 : i32, i32, i32
  }
}

</mosaic_0001>

<bundles_post_ra>
// kernel: tpu_custom_call.1
= control target key start
LH: loop header
LB: loop body
LE: loop exit
PB: predicated region body
PF: predicated region fallthrough
CT: control target
= control target key end

     0   :  { %s2543_s0 = inlined_call_operand.hbm [shape: s32[3], index: 0, kind: input, shape index: {}]   ;;  %s2544_s5 = inlined_call_operand.hbm [shape: f32[3,16,16], index: 5, kind: input, shape index: {}]   ;;  %s2545_s6 = inlined_call_operand.hbm [shape: f32[2,16,128], index: 6, kind: input, shape index: {}]   ;;  %s2546_s7 = inlined_call_operand.hbm [shape: f32[3,128,128], index: 7, kind: input, shape index: {}]   ;;  %s2547_s8 = inlined_call_operand.vmem [shape: f32[3,1,128], index: 8, kind: input, shape index: {}]   ;;  %s2548_s9 = inlined_call_operand.hbm [shape: f32[128,128], index: 9, kind: input, shape index: {}]   ;;  %s2549_s10 = inlined_call_operand.vmem [shape: f32[1,128], index: 10, kind: input, shape index: {}]   ;;  %s2550_s11 = inlined_call_operand.vmem [shape: f32[1,128], index: 11, kind: input, shape index: {}]   ;;  %s2551_s12 = inlined_call_operand.vmem [shape: f32[1,128], index: 12, kind: input, shape index: {}]   ;;  %s2552_s13 = inlined_call_operand.hbm [shape: f32[128,128], index: 13, kind: input, shape index: {}]   ;;  %s2553_s14 = inlined_call_operand.vmem [shape: f32[1,128], index: 14, kind: input, shape index: {}]   ;;  %s2554_s15 = inlined_call_operand.hbm [shape: f32[2,16,128], index: 15, kind: output, shape index: {}]   ;;  %s2555_s1 = inlined_call_operand.vmem [shape: s32[3], index: 1, kind: input, shape index: {}]   ;;  %s2556_s2 = inlined_call_operand.vmem [shape: s32[3], index: 2, kind: input, shape index: {}]   ;;  %s2557_s3 = inlined_call_operand.vmem [shape: s32[3], index: 3, kind: input, shape index: {}]   ;;  %s2558_s4 = inlined_call_operand.vmem [shape: s32[3], index: 4, kind: input, shape index: {}]  }
   0x1   :  { %2577 = sst [smem:[#allocation33_spill]] %s2545_s6  ;;  %s1617_s20 = scalar_lea.hbm %s2543_s0, 16 }
   0x2   :  { %2578 = sst [smem:[#allocation34_spill]] %s2547_s8  ;;  %p1618_p0 = scmp.ne.s32.totalorder %s2543_s0, %s1617_s20 }
   0x3   :  { %2579 = sst [smem:[#allocation35_spill]] %s2548_s9  ;;  %p1621_p1 = scmp.lt.u32.totalorder %s1617_s20, %s2543_s0 }
   0x4   :  { %2580 = sst [smem:[#allocation36_spill]] %s2549_s10 }
   0x5   :  { %2581 = sst [smem:[#allocation37_spill]] %s2550_s11  ;;  %p1623_p2 = pnand %p1621_p1, %p1618_p0 }
   0x6   :  { %2582 = sst [smem:[#allocation38_spill]] %s2551_s12 }
   0x7   :  { %2583 = sst [smem:[#allocation39_spill]] %s2552_s13 }
   0x8   :  { %2584 = sst [smem:[#allocation40_spill]] %s2553_s14 }
   0x9   :  { %2585 = sst [smem:[#allocation41_spill]] %s2554_s15 }
   0xa   :  { %1626 = shalt.err (!%p1623_p2)  }
   0xb   :  { %s1951_s25 = smov [#allocation4]   ;;  %s22_s30 = sshll.u32 %s2555_s1, 4  ;;  %s23_s30 = int_to_ptr.vmem [resolvable:$true] %s22_s30 }
   0xc   :  { %21 = dma.hbm_to_smem %s2543_s0, 16, %s1951_s25, [#allocation3] }
   0xd   :  { %s26_s18 = sshll.u32 %s2556_s2, 4  ;;  %s1627_s19 = scalar_lea.vmem %s23_s30, 16  ;;  %s27_s18 = int_to_ptr.vmem [resolvable:$true] %s26_s18 }
   0xe   :  { %p1628_p3 = scmp.ne.s32.totalorder %s23_s30, %s1627_s19  ;;  %p1632_p4 = scmp.lt.s32.totalorder %s23_s30, %s23_s30 }
   0xf   :  { %p1633_p5 = scmp.lt.s32.totalorder %s1627_s19, %s1627_s19 }
  0x11   :  { %p1634_p6 = por %p1633_p5, %p1632_p4 }
  0x13   :  { %p1635_p7 = pnand %p1634_p6, %p1628_p3 }
  0x15   :  { %1638 = shalt.err (!%p1635_p7)  }
  0x16   :  { %s1952_s20 = smov [#allocation5]   ;;  %s30_s22 = sshll.u32 %s2557_s3, 4  ;;  %s31_s22 = int_to_ptr.vmem [resolvable:$true] %s30_s22 }
  0x17   :  { %25 = dma.vmem_to_smem %s23_s30, 16, %s1952_s20, [#allocation3] }
  0x18   :  { %s1639_s1 = scalar_lea.vmem %s27_s18, 16  ;;  %p1644_p9 = scmp.lt.s32.totalorder %s27_s18, %s27_s18 }
  0x19   :  { %p1640_p8 = scmp.ne.s32.totalorder %s27_s18, %s1639_s1  ;;  %p1645_p10 = scmp.lt.s32.totalorder %s1639_s1, %s1639_s1 }
  0x1b   :  { %p1646_p11 = por %p1645_p10, %p1644_p9 }
  0x1d   :  { %p1647_p12 = pnand %p1646_p11, %p1640_p8 }
  0x1f   :  { %1650 = shalt.err (!%p1647_p12)  }
  0x20   :  { %s1953_s2 = smov [#allocation6]   ;;  %s1651_s23 = scalar_lea.vmem %s31_s22, 16 }
  0x21   :  { %29 = dma.vmem_to_smem %s27_s18, 16, %s1953_s2, [#allocation3] }
  0x22   :  { %p1652_p13 = scmp.ne.s32.totalorder %s31_s22, %s1651_s23  ;;  %p1656_p0 = scmp.lt.s32.totalorder %s31_s22, %s31_s22 }
  0x23   :  { %p1657_p1 = scmp.lt.s32.totalorder %s1651_s23, %s1651_s23 }
  0x25   :  { %p1658_p2 = por %p1657_p1, %p1656_p0 }
  0x27   :  { %p1659_p3 = pnand %p1658_p2, %p1652_p13 }
  0x29   :  { %1662 = shalt.err (!%p1659_p3)  }
  0x2a   :  { %s1954_s24 = smov [#allocation7]   ;;  %s34_s26 = sshll.u32 %s2558_s4, 4  ;;  %s35_s26 = int_to_ptr.vmem [resolvable:$true] %s34_s26 }
  0x2b   :  { %33 = dma.vmem_to_smem %s31_s22, 16, %s1954_s24, [#allocation3] }
  0x2c   :  { %s1663_s27 = scalar_lea.vmem %s35_s26, 16  ;;  %p1668_p5 = scmp.lt.s32.totalorder %s35_s26, %s35_s26 }
  0x2d   :  { %p1664_p4 = scmp.ne.s32.totalorder %s35_s26, %s1663_s27  ;;  %p1669_p6 = scmp.lt.s32.totalorder %s1663_s27, %s1663_s27 }
  0x2f   :  { %p1670_p7 = por %p1669_p6, %p1668_p5 }
  0x31   :  { %p1671_p8 = pnand %p1670_p7, %p1664_p4 }
  0x33   :  { %1674 = shalt.err (!%p1671_p8)  }
  0x34   :  { %s1955_s28 = smov [#allocation8]  }
  0x35   :  { %37 = dma.vmem_to_smem %s35_s26, 16, %s1955_s28, [#allocation3] }
  0x36   :  { %1889 = dma.done.wait [#allocation3], 80 }
  0x37   :  { %1890 = vsyncadd [#allocation3], 4294967216 }
  0x38   :  { %39 = sfence }
  0x39   :  { %40 = vsyncpa [#allocation10], 0 }
  0x3a   :  { %42 = vsyncpa [#allocation10 + $0x1], 0 }
  0x3b   :  { %43 = vsyncpa [#allocation13], 0 }
  0x3c   :  { %45 = vsyncpa [#allocation13 + $0x1], 0 }
  0x3d   :  { %46 = vsyncpa [#allocation16], 0 }
  0x3e   :  { %47 = vsyncpa [#allocation11], 0 }
  0x3f   :  { %49 = vsyncpa [#allocation11 + $0x1], 0  ;;  %s2071_s4 = smov 0   ;;  %s2073_s29 = smov 0  }
  0x40   :  { %s2075_s30 = smov 0   ;;  %s2077_s16 = smov 0  }
  0x41   :  { %s2079_s17 = smov 0   ;;  %s2081_s18 = smov 0  }
  0x42   :  { %s2083_s19 = smov 0   ;;  %s2085_s20 = smov 0  }
  0x43   :  { %s2087_s0 = smov 0   ;;  %s2089_s21 = smov 0  }
  0x44 LB: > { %2586 = sst [smem:[#allocation28_spill]] %s1913_s4  ;;  %s2118_s22 = sadd.s32 4294967295, %s1949_s21   ;;  %s1949_s21 = sphi %s2089_s21, %s2637_s21   ;;  %s1945_s0 = sphi %s2087_s0, %s2636_s0   ;;  %s1941_s20 = sphi %s2085_s20, %s2635_s20   ;;  %s1937_s19 = sphi %s2083_s19, %s2634_s19   ;;  %s1933_s18 = sphi %s2081_s18, %s2633_s18   ;;  %s1929_s17 = sphi %s2079_s17, %s2632_s17   ;;  %s1925_s16 = sphi %s2077_s16, %s2631_s16   ;;  %s1921_s30 = sphi %s2075_s30, %s2628_s30   ;;  %s1917_s29 = sphi %s2073_s29, %s2630_s29   ;;  %s1913_s4 = sphi %s2071_s4, %s2629_s4  }
  0x45   : > { %2587 = sst [smem:[#allocation29_spill]] %s1921_s30  ;;  %s1160_s1 = sadd.s32 4294967294, %s1949_s21  }
  0x46   : > { %s2122_s2 = sadd.s32 1, %s1949_s21   ;;  %p75_p9 = scmp.ne.s32.totalorder %s1941_s20, %s1937_s19 }
  0x47   : > { %p2564_p10 = scmp.eq.s32.totalorder %s2118_s22, 0  ;;  %p103_p11 = scmp.ne.s32.totalorder %s1929_s17, %s1925_s16 }
  0x48   : > { %s291_s23 = sld [smem:[#allocation5 + %s1949_s21]]  ;;  %s296_s26 = sadd.s32 1, %s1921_s30 }
  0x49   : > { %s292_s24 = sld [smem:[#allocation5 + %s2122_s2]]  ;;  %p2131_p12 = por %p2564_p10, %p75_p9 }
  0x4a   : > { %p2137_p13 = por %p103_p11, %p2564_p10  ;;  %p306_p0 = scmp.ne.s32.totalorder %s1921_s30, %s1917_s29 }
  0x4b   : > { %s2588_s3 = scalar_select %p2131_p12, 1, 0 }
  0x4c   : > { %s2589_s25 = scalar_select %p2137_p13, 1, 0 }
  0x4d   : > { %p307_p1 = scmp.eq.s32.totalorder %s2118_s22, 2  ;;  %p312_p2 = scmp.ne.s32.totalorder %s1917_s29, %s1913_s4 }
  0x4e   : > { %p313_p3 = scmp.eq.s32.totalorder %s1160_s1, 2  ;;  %p1161_p4 = scmp.ge.s32.totalorder %s1949_s21, 1 }
  0x4f   : > { %p2148_p5 = por %p307_p1, %p306_p0  ;;  %p320_p6 = scmp.lt.s32.totalorder %s1949_s21, 4 }
  0x50   : > { %s293_s28 = ssub.s32 %s291_s23, %s292_s24  ;;  %p2153_p7 = por %p313_p3, %p312_p2 }
  0x51   : > { %s2590_s27 = scalar_select %p2148_p5, 1, 0 }
  0x52   : > { %s2592_s16 = scalar_select %p2153_p7, 1, 0 }
  0x53   : > { %2591 = sst [smem:[#allocation30_spill]] %s2590_s27  ;;  %p294_p8 = scmp.eq.s32.totalorder %s293_s28, 0 }
  0x54   : > { %2593 = sst [smem:[#allocation31_spill]] %s2592_s16  ;;  %p2157_p9 = pnand %p1161_p4, %p320_p6 }
  0x55   : > { %s2162_s15 = scalar_select %p294_p8, %s1921_s30, %s296_s26  }
  0x56   : > { %s2594_s19 = scalar_select %p2157_p9, 1, 0 }
  0x57   : > { %2595 = sst [smem:[#allocation32_spill]] %s2162_s15  ;;  %p1492_p11 = pneg %p2157_p9 }
  0x58   : > { %s1956_s1 = smov [#allocation15]   ;;  %s2597_s9 = sld [smem:[#allocation35_spill]] }
  0x59   : > { %s332_s4 = sshll.u32 %s1956_s1, 4  ;;  %p2168_p0 = pnand %p1492_p11, %p2564_p10  ;;  %s333_s4 = int_to_ptr.vmem [resolvable:$true] %s332_s4 }
  0x5b   : > { %p1677_p2 = pneg %p2168_p0 }
  0x5e   : > { %s1675_s28 = scalar_lea.hbm %s2597_s9, 2048 }
  0x5f   : > { %p1676_p1 = scmp.ne.s32.totalorder %s2597_s9, %s1675_s28  ;;  %p1682_p6 = scmp.lt.u32.totalorder %s1675_s28, %s2597_s9 }
  0x61   : > { %p1678_p3 = pnand %p1677_p2, %p1676_p1 }
  0x63   : > { %p1679_p4 = pneg %p1678_p3 }
  0x65   : > { %p1684_p8 = pnand %p1682_p6, %p1679_p4 }
  0x67   : > { %1687 = shalt.err (!%p1684_p8)
}
  0x68   : > { %s1688_s16 = scalar_lea.vmem %s333_s4, 2048  ;;  %p1696_p5 = scmp.lt.s32.totalorder %s333_s4, %s333_s4 }
  0x69   : > { %p1689_p11 = scmp.ne.s32.totalorder %s333_s4, %s1688_s16  ;;  %p1697_p13 = scmp.lt.s32.totalorder %s1688_s16, %s1688_s16 }
  0x6b   : > { %p1691_p10 = pnand %p1689_p11, %p1677_p2  ;;  %p1698_p12 = por %p1697_p13, %p1696_p5 }
  0x6d   : > { %p1692_p7 = pneg %p1691_p10 }
  0x6f   : > { %p1699_p9 = pnand %p1698_p12, %p1692_p7 }
  0x71   : > { %1702 = shalt.err (!%p1699_p9)
}
  0x72   : > { %s2570_s14 = smov 128   ;;  %s2572_s27 = smov 8  }
  0x73   : > { %1495 = dma.hbm_to_vmem [thread:$0]  (!%p2168_p0), %s2597_s9, 2048, %s333_s4, [#allocation16], %s2570_s14, %s2570_s14, %s2572_s27  }
  0x74   : > { %p2575_p10 = scmp.eq.s32.totalorder %s1949_s21, 0  ;;  %s85_s26 = sld [smem:[#allocation4 + %s1949_s21]] }
  0x75   : > { %s86_s1 = sld [smem:[#allocation4 + %s2122_s2]]  ;;  %s90_s16 = sadd.s32 1, %s1933_s18 }
  0x76   : > { %p97_p12 = scmp.ne.s32.totalorder %s1933_s18, %s1929_s17  ;;  %p2574_p13 = scmp.lt.s32.totalorder %s1949_s21, 3 }
  0x77   : > { %s394_s30 = sand.u32 1, %s1933_s18   ;;  %s2599_s13 = sld [smem:[#allocation39_spill]] }
  0x78   : > { %p99_p5 = por %p97_p12, %p2575_p10  ;;  %s1168_s12 = sshll.u32 %s394_s30, 4 }
  0x79   : > { %s396_s24 = scalar_lea.vmem [#allocation12], %s1168_s12  ;;  %s1959_s30 = smov [#allocation17]  }
  0x7a   : > { %p2210_p7 = pnand %p2574_p13, %p99_p5  ;;  %s404_s28 = sshll.u32 %s396_s24, 4  ;;  %s2214_s28 = int_to_ptr.vmem [resolvable:$true] %s404_s28 }
  0x7b   : > { %s87_s4 = ssub.s32 %s85_s26, %s86_s1  ;;  %s354_s9 = sshll.u32 %s1959_s30, 4  ;;  %s355_s9 = int_to_ptr.vmem [resolvable:$true] %s354_s9 }
  0x7c   : > { %s2598_s11 = scalar_select %p2210_p7, 1, 0 }
  0x7d   : > { %p88_p9 = scmp.eq.s32.totalorder %s87_s4, 0  ;;  %s1703_s12 = scalar_lea.hbm %s2599_s13, 2048 }
  0x7e   : > { %s1477_s14 = scalar_select %p99_p5, [#allocation4], [#allocation19] }
  0x7f   : > { %s2217_s27 = scalar_select %p88_p9, %s1933_s18, %s90_s16  }
  0x80   : > { %s1478_s15 = scalar_select %p99_p5, %s1949_s21, 0 }
  0x81   : > { %s2639_s14 = smov (!%p2574_p13, %s1477_s14), [#allocation21]  ;;  %p1704_p1 = scmp.ne.s32.totalorder %s2599_s13, %s1703_s12 }
  0x82   : > { %s2641_s15 = smov (!%p2574_p13, %s1478_s15), 0  ;;  %p1710_p6 = scmp.lt.u32.totalorder %s1703_s12, %s2599_s13 }
  0x83   : > { %s397_s10 = sld [smem:[%s2639_s14 + %s2641_s15]]  ;;  %p1706_p3 = pnand %p1704_p1, %p1677_p2 }
  0x85   : > { %p1707_p4 = pneg %p1706_p3 }
  0x87   : > { %p1712_p8 = pnand %p1710_p6, %p1707_p4 }
  0x89   : > { %1715 = shalt.err (!%p1712_p8)
}
  0x8a   : > { %s1716_s15 = scalar_lea.vmem %s355_s9, 2048  ;;  %p1724_p9 = scmp.lt.s32.totalorder %s355_s9, %s355_s9 }
  0x8b   : > { %p1717_p11 = scmp.ne.s32.totalorder %s355_s9, %s1716_s15  ;;  %p1725_p13 = scmp.lt.s32.totalorder %s1716_s15, %s1716_s15 }
  0x8d   : > { %p1719_p12 = pnand %p1717_p11, %p1677_p2  ;;  %p1726_p10 = por %p1725_p13, %p1724_p9 }
  0x8f   : > { %p1720_p5 = pneg %p1719_p12 }
  0x91   : > { %p1727_p7 = pnand %p1726_p10, %p1720_p5 }
  0x93   : > { %1730 = shalt.err (!%p1727_p7)
}
  0x94   : > { %s2600_s8 = smov 8   ;;  %s2601_s14 = smov 128  }
  0x95   : > { %1498 = dma.hbm_to_vmem [thread:$0]  (!%p2168_p0), %s2599_s13, 2048, %s355_s9, [#allocation16], %s2601_s14, %s2601_s14, %s2600_s8  }
  0x96   : > { %s59_s12 = ssub.s32 %s1949_s21, %s2122_s2  ;;  %s62_s23 = sadd.s32 1, %s1945_s0 }
  0x97   : > { %p60_p2 = scmp.eq.s32.totalorder %s59_s12, 0  ;;  %p69_p10 = scmp.ne.s32.totalorder %s1945_s0, %s1941_s20 }
  0x98   : > { %s1199_s4 = sshll.u32 %s397_s10, 8  ;;  %p2602_p13 = scmp.eq.s32.totalorder %s1949_s21, 0 }
  0x99   : > { %s2253_s1 = scalar_select %p60_p2, %s1945_s0, %s62_s23  }
  0x9a   : > { %p2257_p7 = por %p2602_p13, %p69_p10  ;;  %s2604_s6 = sld [smem:[#allocation33_spill]] }
  0x9b   : > { %s2267_s9 = sand.u32 1, %s1945_s0   ;;  %s2605_s26 = sand.u32 1, %s1949_s21  }
  0x9c   : > { %s2271_s12 = scalar_lea.sflag [#allocation13], %s2605_s26  ;;  %p2606_p1 = scmp.ne.s32.totalorder %s2598_s11, 0 }
  0x9e   : > { %p1733_p3 = pneg %p2606_p1 }
  0xa0   : > { %s2264_s30 = scalar_lea.hbm %s2604_s6, %s1199_s4  ;;  %s1736_s24 = scalar_lea.hbm %s2604_s6, 512 }
  0xa1   : > { %s1731_s10 = scalar_lea.hbm %s2264_s30, 256  ;;  %p1737_p8 = scmp.lt.u32.totalorder %s2264_s30, %s2604_s6 }
  0xa2   : > { %p1732_p0 = scmp.ne.s32.totalorder %s2264_s30, %s1731_s10  ;;  %p1738_p11 = scmp.lt.u32.totalorder %s1736_s24, %s1731_s10 }
  0xa3   : > { %p1740_p5 = scmp.lt.u32.totalorder %s1731_s10, %s2264_s30 }
  0xa4   : > { %p1734_p4 = pnand %p1733_p3, %p1732_p0  ;;  %p1739_p12 = por %p1738_p11, %p1737_p8 }
  0xa6   : > { %p1735_p6 = pneg %p1734_p4  ;;  %p1741_p9 = por %p1740_p5, %p1739_p12 }
  0xa8   : > { %p1742_p2 = pnand %p1741_p9, %p1735_p6 }
  0xaa   : > { %1745 = shalt.err (!%p1742_p2)
}
  0xab   : > { %s1746_s26 = scalar_lea.vmem %s2214_s28, 256  ;;  %s1960_s23 = smov [#allocation12]  }
  0xac   : > { %p1747_p10 = scmp.ne.s32.totalorder %s2214_s28, %s1746_s26  ;;  %s1751_s4 = sshll.u32 %s1960_s23, 4  ;;  %s1752_s4 = int_to_ptr.vmem [resolvable:$false] %s1751_s4 }
  0xad   : > { %s1753_s13 = scalar_lea.vmem %s1752_s4, 512  ;;  %p1754_p4 = scmp.lt.s32.totalorder %s2214_s28, %s1752_s4 }
  0xae   : > { %p1749_p13 = pnand %p1747_p10, %p1733_p3  ;;  %p1755_p8 = scmp.lt.s32.totalorder %s1753_s13, %s1746_s26 }
  0xb0   : > { %p1750_p0 = pneg %p1749_p13  ;;  %p1756_p11 = por %p1755_p8, %p1754_p4 }
  0xb2   : > { %p1757_p12 = pnand %p1756_p11, %p1750_p0 }
  0xb4   : > { %1760 = shalt.err (!%p1757_p12)
}
  0xb5   : > { %1507 = dma.hbm_to_vmem [thread:$0]  (!%p2606_p1), %s2264_s30, 256, %s2214_s28, %s2271_s12, %s2601_s14, %s2601_s14, %s2600_s8  }
  0xb6   : > { %s1165_s10 = sshll.u32 %s2267_s9, 4  ;;  %s1198_s24 = sshll.u32 %s1949_s21, 8 }
  0xb7   : > { %s2307_s11 = scalar_lea.hbm %s2544_s5, %s1198_s24  ;;  %s375_s23 = scalar_lea.vmem [#allocation9], %s1165_s10 }
  0xb8   : > { %s382_s4 = sshll.u32 %s375_s23, 4  ;;  %p2607_p3 = scmp.lt.s32.totalorder %s1949_s21, 3  ;;  %s2309_s4 = int_to_ptr.vmem [resolvable:$true] %s382_s4 }
  0xb9   : > { %s1200_s30 = sshll.u32 %s1949_s21, 11  ;;  %s372_s24 = scalar_lea.sflag [#allocation10], %s2267_s9 }
  0xba   : > { %p2315_p6 = pnand %p2607_p3, %p2257_p7  ;;  %s1761_s15 = scalar_lea.hbm %s2307_s11, 256 }
  0xbb   : > { %p1762_p1 = scmp.ne.s32.totalorder %s2307_s11, %s1761_s15  ;;  %s1766_s26 = scalar_lea.hbm %s2544_s5, 768 }
  0xbc   : > { %p1763_p5 = pneg %p2315_p6  ;;  %p1767_p7 = scmp.lt.u32.totalorder %s2307_s11, %s2544_s5 }
  0xbd   : > { %p1768_p10 = scmp.lt.u32.totalorder %s1766_s26, %s1761_s15  ;;  %p1770_p0 = scmp.lt.u32.totalorder %s1761_s15, %s2307_s11 }
  0xbe   : > { %p1764_p9 = pnand %p1763_p5, %p1762_p1 }
  0xbf   : > { %p1769_p13 = por %p1768_p10, %p1767_p7 }
  0xc0   : > { %p1765_p2 = pneg %p1764_p9 }
  0xc1   : > { %p1771_p4 = por %p1770_p0, %p1769_p13 }
  0xc3   : > { %p1772_p8 = pnand %p1771_p4, %p1765_p2 }
  0xc5   : > { %1775 = shalt.err (!%p1772_p8)
}
  0xc6   : > { %s1776_s28 = scalar_lea.vmem %s2309_s4, 256  ;;  %s1961_s10 = smov [#allocation9]  }
  0xc7   : > { %p1777_p11 = scmp.ne.s32.totalorder %s2309_s4, %s1776_s28  ;;  %s1781_s16 = sshll.u32 %s1961_s10, 4  ;;  %s1782_s16 = int_to_ptr.vmem [resolvable:$false] %s1781_s16 }
  0xc8   : > { %s1783_s6 = scalar_lea.vmem %s1782_s16, 512  ;;  %p1784_p1 = scmp.lt.s32.totalorder %s2309_s4, %s1782_s16 }
  0xc9   : > { %p1779_p12 = pnand %p1777_p11, %p1763_p5  ;;  %p1785_p9 = scmp.lt.s32.totalorder %s1783_s6, %s1776_s28 }
  0xcb   : > { %p1780_p3 = pneg %p1779_p12  ;;  %p1786_p7 = por %p1785_p9, %p1784_p1 }
  0xcd   : > { %p1787_p10 = pnand %p1786_p7, %p1780_p3 }
  0xcf   : > { %1790 = shalt.err (!%p1787_p10)
}
  0xd0   : > { %1502 = dma.hbm_to_vmem [thread:$0]  (!%p2315_p6), %s2307_s11, 256, %s2309_s4, %s372_s24, %s2601_s14, %s2601_s14, %s2600_s8  }
  0xd1   : > { %s2357_s28 = scalar_lea.hbm %s2546_s7, %s1200_s30  ;;  %s2609_s23 = sshll.u32 %s2267_s9, 7 }
  0xd2   : > { %s418_s10 = scalar_lea.vmem [#allocation14], %s2609_s23  ;;  %s1791_s6 = scalar_lea.hbm %s2357_s28, 2048 }
  0xd3   : > { %s425_s16 = sshll.u32 %s418_s10, 4  ;;  %p1792_p2 = scmp.ne.s32.totalorder %s2357_s28, %s1791_s6  ;;  %s2361_s16 = int_to_ptr.vmem [resolvable:$true] %s425_s16 }
  0xd4   : > { %s1796_s30 = scalar_lea.hbm %s2546_s7, 6144  ;;  %p1797_p4 = scmp.lt.u32.totalorder %s2357_s28, %s2546_s7 }
  0xd5   : > { %p1794_p13 = pnand %p1792_p2, %p1763_p5  ;;  %p1798_p8 = scmp.lt.u32.totalorder %s1796_s30, %s1791_s6 }
  0xd6   : > { %p1800_p12 = scmp.lt.u32.totalorder %s1791_s6, %s2357_s28 }
  0xd7   : > { %p1795_p0 = pneg %p1794_p13  ;;  %p1799_p11 = por %p1798_p8, %p1797_p4 }
  0xd9   : > { %p1801_p3 = por %p1800_p12, %p1799_p11 }
  0xdb   : > { %p1802_p1 = pnand %p1801_p3, %p1795_p0 }
  0xdd   : > { %1805 = shalt.err (!%p1802_p1)
}
  0xde   : > { %s1806_s15 = scalar_lea.vmem %s2361_s16, 2048  ;;  %s1962_s26 = smov [#allocation14]  }
  0xdf   : > { %p1807_p9 = scmp.ne.s32.totalorder %s2361_s16, %s1806_s15  ;;  %s1811_s23 = sshll.u32 %s1962_s26, 4  ;;  %s1812_s23 = int_to_ptr.vmem [resolvable:$false] %s1811_s23 }
  0xe0   : > { %s1813_s10 = scalar_lea.vmem %s1812_s23, 4096  ;;  %p1814_p2 = scmp.lt.s32.totalorder %s2361_s16, %s1812_s23 }
  0xe1   : > { %p1809_p7 = pnand %p1807_p9, %p1763_p5  ;;  %p1815_p13 = scmp.lt.s32.totalorder %s1813_s10, %s1806_s15 }
  0xe3   : > { %p1810_p10 = pneg %p1809_p7  ;;  %p1816_p4 = por %p1815_p13, %p1814_p2 }
  0xe5   : > { %p1817_p8 = pnand %p1816_p4, %p1810_p10 }
  0xe7   : > { %1820 = shalt.err (!%p1817_p8)
}
  0xe8   : > { %1510 = dma.hbm_to_vmem [thread:$0]  (!%p2315_p6), %s2357_s28, 2048, %s2361_s16, %s2271_s12, %s2601_s14, %s2601_s14, %s2600_s8  }
  0xe9   : > { %p2610_p5 = scmp.ne.s32.totalorder %s2594_s19, 0 }
  0xea   : > { %s445_s6 = sand.u32 (!%p2610_p5), 1, %s1941_s20   ;;  %p2611_p0 = scmp.ne.s32.totalorder (!%p2610_p5), %s2588_s3, 0 }
  0xeb   : > { %443 = sbr.rel (%p2610_p5) target bundleno = 1276 (0x4fc), region = 60  ;;  %s1175_s11 = sshll.u32 (!%p2610_p5), %s445_s6, 4 }
  0xec   : > { %s446_s4 = scalar_lea.sflag (!%p2610_p5), [#allocation10], %s445_s6  ;;  %s2393_s30 = scalar_lea.vmem (!%p2610_p5), [#allocation9], %s1175_s11 }
  0xf2   : > { %1892 = dma.done.wait (%p2611_p0), %s446_s4, 256  }
  0xf3   : > { %1894 = vsyncadd (%p2611_p0), %s446_s4, 4294967040  ;;  %s454_s13 = sand.u32 1, %s2118_s22   ;;  %s456_s8 = sand.u32 1, %s1929_s17  }
  0xf4   : > { %s1176_s14 = sshll.u32 %s456_s8, 4  ;;  %s455_s19 = scalar_lea.sflag [#allocation13], %s454_s13 }
  0xf5   : > { %s458_s12 = scalar_lea.vmem [#allocation12], %s1176_s14  ;;  %p2612_p6 = scmp.ne.s32.totalorder %s2589_s25, 0 }
  0xf7   : > { %1896 = dma.done.wait (%p2612_p6), %s455_s19, 256  }
  0xf8   : > { %1898 = vsyncadd (%p2612_p6), %s455_s19, 4294967040  ;;  %s1177_s28 = sshll.u32 %s445_s6, 7 }
  0xf9   : > { %s2405_s16 = scalar_lea.vmem [#allocation14], %s1177_s28 }
  0xfa   : > { %1900 = dma.done.wait (%p2611_p0), %s455_s19, 2048  }
  0xfb   : > { %1902 = vsyncadd (%p2611_p0), %s455_s19, 4294965248  ;;  %p2613_p11 = scmp.eq.s32.totalorder %s2118_s22, 0 }
  0xfd   : > { %1904 = dma.done.wait (%p2613_p11), [#allocation16], 4096   ;;  %p2614_p12 = pmov %p2613_p11 }
  0xfe   : > { %s522_s25 = sand.u32 1, %s1917_s29   ;;  %s2417_s24 = sld [smem:[#allocation6 + %s2118_s22]]  ;;  %vm551_vm0 = vcmask 130048   ;;  %v532_v0 = vld [vmem:[%s458_s12] sm:$0xff]  ;;  %v533_v1 = vld [vmem:[%s458_s12 + $0x8] sm:$0xff] }
  0xff   : > { %1906 = vsyncadd (%p2614_p12), [#allocation16], 4294963200  ;;  %s2421_s3 = sshll.u32 %s522_s25, 4  ;;  %v530_v2 = vld [vmem:[%s2393_s30] sm:$0xff]  ;;  %v1372_v3 = vpack.c.bf16 %v533_v1, %v532_v0  ;;  %v535_v5 = vld [vmem:[%s2405_s16 + $0x8] sm:$0xff]  ;;  %p526_p3 = scmp.lt.s32.totalorder %s2118_s22, 2 }
 0x100   : > { %1264 = vmatprep.mubr.msk.f32.mxu0 %vm551_vm0, %v530_v2  ;;  %v534_v4 = vld [vmem:[%s2405_s16] sm:$0xff]  ;;  %v536_v7 = vld [vmem:[%s2405_s16 + $0x10] sm:$0xff]  ;;  %v537_v8 = vld [vmem:[%s2405_s16 + $0x18] sm:$0xff]  ;;  %s2615_s23 = sld [smem:[#allocation34_spill]]  ;;  %s2449_s6 = scalar_lea.vmem [#allocation18], %s2421_s3 }
 0x101   : > { %v1376_v6 = vpack.c.bf16 %v535_v5, %v534_v4  ;;  %1373 = vmatprep.subr.bf16.mxu0 %v1372_v3  ;;  %v1380_v9 = vpack.c.bf16 %v537_v8, %v536_v7  ;;  %v538_v10 = vld [vmem:[%s2405_s16 + $0x20] sm:$0xff]  ;;  %v539_v11 = vld [vmem:[%s2405_s16 + $0x28] sm:$0xff]  ;;  %v540_v14 = vld [vmem:[%s2405_s16 + $0x30] sm:$0xff]  ;;  %s527_s9 = scalar_select %p526_p3, %s2118_s22, 2 }
 0x102   : > { %1375 = vmatpush3.bf16.msra.mxu0 %v1372_v3  ;;  %v531_v12 = vld [vmem:[%s2393_s30 + $0x8] sm:$0xff]  ;;  %v1384_v13 = vpack.c.bf16 %v539_v11, %v538_v10  ;;  %v542_v17 = vld [vmem:[%s2405_s16 + $0x40] sm:$0xff]  ;;  %v544_v20 = vld [vmem:[%s2405_s16 + $0x50] sm:$0xff] }
 0x103   : > { %1377 = vmatprep.subr.bf16.mxu1 %v1376_v6  ;;  %v541_v15 = vld [vmem:[%s2405_s16 + $0x38] sm:$0xff]  ;;  %v543_v18 = vld [vmem:[%s2405_s16 + $0x48] sm:$0xff]  ;;  %v546_v23 = vld [vmem:[%s2405_s16 + $0x60] sm:$0xff] }
 0x104   : > { %1379 = vmatpush3.bf16.msra.mxu1 %v1376_v6  ;;  %v1388_v16 = vpack.c.bf16 %v541_v15, %v540_v14  ;;  %v1392_v19 = vpack.c.bf16 %v543_v18, %v542_v17  ;;  %v545_v21 = vld [vmem:[%s2405_s16 + $0x58] sm:$0xff]  ;;  %v547_v24 = vld [vmem:[%s2405_s16 + $0x68] sm:$0xff]  ;;  %v548_v26 = vld [vmem:[%s2405_s16 + $0x70] sm:$0xff]  ;;  %p1184_p1 = scmp.ne.s32.totalorder %s2417_s24, 1 }
 0x105   : > { %1381 = vmatprep.subr.bf16.mxu1 %v1380_v9  ;;  %1265 = vmatmul.mubr.msk.f32.vlgmr.msra.gmra.mrb[0].mxu0 %vm551_vm0, %v531_v12  ;;  %v1396_v22 = vpack.c.bf16 %v545_v21, %v544_v20  ;;  %v1400_v25 = vpack.c.bf16 %v547_v24, %v546_v23  ;;  %v549_v27 = vld [vmem:[%s2405_s16 + $0x78] sm:$0xff] }
 0x106   : > { %v1404_v28 = vpack.c.bf16 %v549_v27, %v548_v26  ;;  %s528_s10 = scalar_lea.vmem %s2615_s23, %s527_s9 }
 0x107   : > { %v1183_v31 = vld [vmem:[%s528_s10] ss:$0 sm:$0xff] }
 0x108   : > { %1383 = vmatpush3.bf16.msra.mxu1 %v1380_v9 }
 0x109   : > { %1385 = vmatprep.subr.bf16.mxu1 %v1384_v13 }
 0x10c   : > { %1387 = vmatpush3.bf16.msra.mxu1 %v1384_v13 }
 0x10d   : > { %1389 = vmatprep.subr.bf16.mxu1 %v1388_v16 }
 0x110   : > { %1391 = vmatpush3.bf16.msra.mxu1 %v1388_v16 }
 0x111   : > { %1393 = vmatprep.subr.bf16.mxu1 %v1392_v19 }
 0x114   : > { %1395 = vmatpush3.bf16.msra.mxu1 %v1392_v19 }
 0x115   : > { %1397 = vmatprep.subr.bf16.mxu1 %v1396_v22 }
 0x118   : > { %1399 = vmatpush3.bf16.msra.mxu1 %v1396_v22 }
 0x119   : > { %1401 = vmatprep.subr.bf16.mxu1 %v1400_v25 }
 0x11c   : > { %1403 = vmatpush3.bf16.msra.mxu1 %v1400_v25 }
 0x11d   : > { %1405 = vmatprep.subr.bf16.mxu1 %v1404_v28 }
 0x120   : > { %1407 = vmatpush3.bf16.msra.mxu1 %v1404_v28 }
 0x1d8   : > { %v1266_v29 = vpop.f32.mrb[0].mxu0 }
 0x1d9   : > { %v624_v30 = vpop.f32.mrb[1].mxu0 }
 0x1da   : > { %1299 = vmatprep.mubr.f32.mxu1 %v624_v30 }
 0x1db   : > { %1300 = vmatmul.mubr.f32.vlgmr.msra.gmra.mrb[0].mxu1 %v1266_v29 }
 0x2aa   : > { %718 = sbr.rel (%p1184_p1) target bundleno = 691 (0x2b3), region = 84 }
 0x2ae   : > { %v1301_v32 = vpop.f32.mrb[0].mxu1 }
 0x2af   : > { %v711_v33 = vadd.f32 %v1301_v32, %v1183_v31  ;;  %v705_v34 = vpop.f32.mrb[1].mxu1 }
 0x2b0   : > { %v706_v35 = vadd.f32 %v1183_v31, %v705_v34 }
 0x2b1   : > { %720 = vst [vmem:[#allocation2 + $0x8] sm:$0xff] %v711_v33 }
 0x2b2   : > { %719 = vst [vmem:[#allocation2] sm:$0xff] %v706_v35 }
 0x2b3 PF: > { %s721_s11 = sld [smem:[#allocation6 + %s2118_s22]] }
 0x2b9   : > { %p1185_p9 = scmp.ne.s32.totalorder %s721_s11, 0 }
 0x2ba   : > { %v726_v36 = vld [vmem:[#allocation2] sm:$0xff] (!%p1185_p9)  ;;  %v727_v37 = vld [vmem:[#allocation2 + $0x8] sm:$0xff] (!%p1185_p9) }
 0x2bb   : > { %725 = sbr.rel (%p1185_p9) target bundleno = 706 (0x2c2), region = 88  ;;  %v728_v38 = vadd.f32 (!%p1185_p9), %v726_v36, %v706_v35  ;;  %v729_v39 = vadd.f32 (!%p1185_p9), %v727_v37, %v711_v33 }
 0x2bd   : > { %730 = vst [vmem:[#allocation2] sm:$0xff] (!%p1185_p9), %v728_v38  ;;  %731 = vst [vmem:[#allocation2 + $0x8] sm:$0xff] (!%p1185_p9), %v729_v39 }
 0x2c2 PF: > { %s732_s4 = sld [smem:[#allocation7 + %s2118_s22]] }
 0x2c8   : > { %p1186_p7 = scmp.ne.s32.totalorder %s732_s4, 1 }
 0x2c9   : > { %v740_v40 = vld [vmem:[#allocation15] sm:$0xff] (!%p1186_p7)  ;;  %v741_v41 = vld [vmem:[#allocation15 + $0x8] sm:$0xff] (!%p1186_p7)  ;;  %v742_v42 = vld [vmem:[#allocation15 + $0x10] sm:$0xff] (!%p1186_p7)  ;;  %v840_v26 = vlaneseq (!%p1186_p7)  ;;  %s737_s30 = sld [smem:[#allocation8 + %s2118_s22]] (!%p1186_p7)  ;;  %v1963_v34 = vmov (!%p1186_p7), 0.0  }
 0x2ca   : > { %736 = sbr.rel (%p1186_p7) target bundleno = 1243 (0x4db), region = 92  ;;  %v1408_v43 = vpack.c.bf16 (!%p1186_p7), %v741_v41, %v740_v40  ;;  %v743_v44 = vld [vmem:[#allocation15 + $0x18] sm:$0xff] (!%p1186_p7)  ;;  %v744_v46 = vld [vmem:[#allocation15 + $0x20] sm:$0xff] (!%p1186_p7)  ;;  %v745_v47 = vld [vmem:[#allocation15 + $0x28] sm:$0xff] (!%p1186_p7)  ;;  %s2616_s14 = sld [smem:[#allocation36_spill]] (!%p1186_p7) }
 0x2cb   : > { %v1412_v45 = vpack.c.bf16 (!%p1186_p7), %v743_v44, %v742_v42  ;;  %v1416_v48 = vpack.c.bf16 (!%p1186_p7), %v745_v47, %v744_v46  ;;  %v738_v49 = vld [vmem:[#allocation2] sm:$0xff] (!%p1186_p7)  ;;  %v747_v51 = vld [vmem:[#allocation15 + $0x38] sm:$0xff] (!%p1186_p7)  ;;  %v748_v53 = vld [vmem:[#allocation15 + $0x40] sm:$0xff] (!%p1186_p7)  ;;  %v841_v27 = vshrl.u32 (!%p1186_p7), %v840_v26, 7  ;;  %s2617_s16 = sld [smem:[#allocation37_spill]] (!%p1186_p7)  ;;  %s2618_s9 = sld [smem:[#allocation38_spill]] (!%p1186_p7) }
 0x2cc   : > { %1409 = vmatprep.subr.bf16.mxu0 (!%p1186_p7), %v1408_v43  ;;  %v746_v50 = vld [vmem:[#allocation15 + $0x30] sm:$0xff] (!%p1186_p7)  ;;  %1334 = vmatprep.mubr.f32.mxu0 (!%p1186_p7), %v738_v49  ;;  %v749_v54 = vld [vmem:[#allocation15 + $0x48] sm:$0xff] (!%p1186_p7)  ;;  %v751_v57 = vld [vmem:[#allocation15 + $0x58] sm:$0xff] (!%p1186_p7)  ;;  %s2619_s23 = sld [smem:[#allocation40_spill]] (!%p1186_p7) }
 0x2cd   : > { %1411 = vmatpush3.bf16.msra.mxu0 (!%p1186_p7), %v1408_v43  ;;  %v1420_v52 = vpack.c.bf16 (!%p1186_p7), %v747_v51, %v746_v50  ;;  %v1424_v55 = vpack.c.bf16 (!%p1186_p7), %v749_v54, %v748_v53  ;;  %v750_v56 = vld [vmem:[#allocation15 + $0x50] sm:$0xff] (!%p1186_p7)  ;;  %v752_v59 = vld [vmem:[#allocation15 + $0x60] sm:$0xff] (!%p1186_p7)  ;;  %v753_v60 = vld [vmem:[#allocation15 + $0x68] sm:$0xff] (!%p1186_p7)  ;;  %v842_v28 = vadd.s32 (!%p1186_p7), 8, %v841_v27 }
 0x2ce   : > { %1413 = vmatprep.subr.bf16.mxu0 (!%p1186_p7), %v1412_v45  ;;  %v1428_v58 = vpack.c.bf16 (!%p1186_p7), %v751_v57, %v750_v56  ;;  %v1432_v61 = vpack.c.bf16 (!%p1186_p7), %v753_v60, %v752_v59  ;;  %v754_v62 = vld [vmem:[#allocation15 + $0x70] sm:$0xff] (!%p1186_p7)  ;;  %v755_v63 = vld [vmem:[#allocation15 + $0x78] sm:$0xff] (!%p1186_p7)  ;;  %v899_v2 = vld [vmem:[#allocation17] sm:$0xff] (!%p1186_p7) }
 0x2cf   : > { %v1436_v0 = vpack.c.bf16 (!%p1186_p7), %v755_v63, %v754_v62  ;;  %v739_v1 = vld [vmem:[#allocation2 + $0x8] sm:$0xff] (!%p1186_p7)  ;;  %v900_v3 = vld [vmem:[#allocation17 + $0x8] sm:$0xff] (!%p1186_p7)  ;;  %v901_v5 = vld [vmem:[#allocation17 + $0x10] sm:$0xff] (!%p1186_p7)  ;;  %v843_v29 = vstv (!%p1186_p7), %s737_s30  ;;  %s850_s19 = scvt.s32.f32 (!%p1186_p7), %s737_s30 }
 0x2d0   : > { %v1440_v4 = vpack.c.bf16 (!%p1186_p7), %v900_v3, %v899_v2  ;;  %v902_v6 = vld [vmem:[#allocation17 + $0x18] sm:$0xff] (!%p1186_p7)  ;;  %v903_v8 = vld [vmem:[#allocation17 + $0x20] sm:$0xff] (!%p1186_p7)  ;;  %v904_v9 = vld [vmem:[#allocation17 + $0x28] sm:$0xff] (!%p1186_p7)  ;;  %vm845_vm1 = vcmp.lt.s32.totalorder (!%p1186_p7), %v842_v28, %v843_v29  ;;  %vm844_vm2 = vcmp.lt.s32.totalorder (!%p1186_p7), %v841_v27, %v843_v29 }
 0x2d1   : > { %1415 = vmatpush3.bf16.msra.mxu0 %v1412_v45  ;;  %v1444_v7 = vpack.c.bf16 %v902_v6, %v901_v5  ;;  %v1448_v10 = vpack.c.bf16 %v904_v9, %v903_v8  ;;  %v905_v11 = vld [vmem:[#allocation17 + $0x30] sm:$0xff]  ;;  %v906_v12 = vld [vmem:[#allocation17 + $0x38] sm:$0xff]  ;;  %v907_v14 = vld [vmem:[#allocation17 + $0x40] sm:$0xff]  ;;  %v1189_v35 = vsel %vm845_vm1, 1.0, %v1963_v34  ;;  %v1188_v38 = vsel %vm844_vm2, 1.0, %v1963_v34 }
 0x2d2   : > { %1417 = vmatprep.subr.bf16.mxu0 %v1416_v48  ;;  %1441 = vmatprep.subr.bf16.mxu1 %v1440_v4  ;;  %v1452_v13 = vpack.c.bf16 %v906_v12, %v905_v11  ;;  %v908_v15 = vld [vmem:[#allocation17 + $0x48] sm:$0xff]  ;;  %v909_v17 = vld [vmem:[#allocation17 + $0x50] sm:$0xff]  ;;  %v910_v18 = vld [vmem:[#allocation17 + $0x58] sm:$0xff]  ;;  %v860_v42 = vstv %s850_s19 }
 0x2d3   : > { %1443 = vmatpush3.bf16.msra.mxu1 %v1440_v4  ;;  %v1456_v16 = vpack.c.bf16 %v908_v15, %v907_v14  ;;  %v1460_v19 = vpack.c.bf16 %v910_v18, %v909_v17  ;;  %v911_v20 = vld [vmem:[#allocation17 + $0x60] sm:$0xff]  ;;  %v912_v21 = vld [vmem:[#allocation17 + $0x68] sm:$0xff]  ;;  %v913_v23 = vld [vmem:[#allocation17 + $0x70] sm:$0xff]  ;;  %1613 = vrcp.f32 %v860_v42 }
 0x2d4   : > { %1445 = vmatprep.subr.bf16.mxu1 %v1444_v7  ;;  %v1464_v22 = vpack.c.bf16 %v912_v21, %v911_v20  ;;  %v914_v24 = vld [vmem:[#allocation17 + $0x78] sm:$0xff]  ;;  %v1187_v30 = vld [vmem:[%s2616_s14] ss:$0 sm:$0xff] }
 0x2d5   : > { %1419 = vmatpush3.bf16.msra.mxu0 %v1416_v48  ;;  %v1468_v25 = vpack.c.bf16 %v914_v24, %v913_v23  ;;  %v1190_v4 = vld [vmem:[%s2617_s16] ss:$0 sm:$0xff] }
 0x2d6   : > { %1421 = vmatprep.subr.bf16.mxu0 %v1420_v52  ;;  %v1192_v12 = vld [vmem:[%s2619_s23] ss:$0 sm:$0xff] }
 0x2d7   : > { %1447 = vmatpush3.bf16.msra.mxu1 %v1444_v7  ;;  %v1191_v7 = vld [vmem:[%s2618_s9] ss:$0 sm:$0xff] }
 0x2d8   : > { %1449 = vmatprep.subr.bf16.mxu1 %v1448_v10 }
 0x2d9   : > { %1423 = vmatpush3.bf16.msra.mxu0 %v1420_v52 }
 0x2da   : > { %1425 = vmatprep.subr.bf16.mxu0 %v1424_v55 }
 0x2db   : > { %1451 = vmatpush3.bf16.msra.mxu1 %v1448_v10 }
 0x2dc   : > { %1453 = vmatprep.subr.bf16.mxu1 %v1452_v13 }
 0x2dd   : > { %1427 = vmatpush3.bf16.msra.mxu0 %v1424_v55  ;;  %v1614_v49 = vpop.eup %1613 }
 0x2de   : > { %1429 = vmatprep.subr.bf16.mxu0 %v1428_v58 }
 0x2df   : > { %1455 = vmatpush3.bf16.msra.mxu1 %v1452_v13 }
 0x2e0   : > { %1457 = vmatprep.subr.bf16.mxu1 %v1456_v16 }
 0x2e1   : > { %1431 = vmatpush3.bf16.msra.mxu0 %v1428_v58 }
 0x2e2   : > { %1433 = vmatprep.subr.bf16.mxu0 %v1432_v61 }
 0x2e3   : > { %1459 = vmatpush3.bf16.msra.mxu1 %v1456_v16 }
 0x2e4   : > { %1461 = vmatprep.subr.bf16.mxu1 %v1460_v19 }
 0x2e5   : > { %1435 = vmatpush3.bf16.msra.mxu0 %v1432_v61 }
 0x2e6   : > { %1437 = vmatprep.subr.bf16.mxu0 %v1436_v0 }
 0x2e7   : > { %1463 = vmatpush3.bf16.msra.mxu1 %v1460_v19 }
 0x2e8   : > { %1465 = vmatprep.subr.bf16.mxu1 %v1464_v22 }
 0x2e9   : > { %1439 = vmatpush3.bf16.msra.mxu0 %v1436_v0 }
 0x2eb   : > { %1467 = vmatpush3.bf16.msra.mxu1 %v1464_v22 }
 0x2ec   : > { %1335 = vmatmul.mubr.f32.vlgmr.msra.gmra.mrb[0].mxu0 %v739_v1  ;;  %1469 = vmatprep.subr.bf16.mxu1 %v1468_v25 }
 0x2ef   : > { %1471 = vmatpush3.bf16.msra.mxu1 %v1468_v25 }
 0x3bf   : > { %v1336_v31 = vpop.f32.mrb[0].mxu0 }
 0x3c0   : > { %v835_v32 = vadd.f32 %v1336_v31, %v1187_v30  ;;  %v829_v33 = vpop.f32.mrb[1].mxu0 }
 0x3c1   : > { %v830_v36 = vadd.f32 %v1187_v30, %v829_v33 }
 0x3c2   : > { %v839_v37 = vmax.f32 %v835_v32, 0.0 }
 0x3c3   : > { %v838_v39 = vmax.f32 %v830_v36, 0.0 }
 0x3c4   : > { %v852_v40 = vmul.f32 %v1189_v35, %v839_v37 }
 0x3c5   : > { %v851_v41 = vmul.f32 %v1188_v38, %v838_v39 }
 0x3c7   : > { %v853_v43 = vadd.f32 %v852_v40, %v851_v41 }
 0x3c9   : > { %v854_v44 = vrot.slane %v853_v43, 4 }
 0x3cb   : > { %v855_v45 = vadd.f32 %v854_v44, %v853_v43 }
 0x3cd   : > { %v856_v46 = vrot.slane %v855_v45, 2 }
 0x3cf   : > { %v857_v47 = vadd.f32 %v856_v46, %v855_v45 }
 0x3d1   : > { %v858_v48 = vrot.slane %v857_v47, 1 }
 0x3d3   : > { %v859_v50 = vadd.f32 %v858_v48, %v857_v47 }
 0x3d5   : > { %v862_v51 = vmul.f32 %v1614_v49, %v859_v50 }
 0x3d7   : > { %v863_v52 = vsub.f32 %v838_v39, %v862_v51  ;;  %v864_v53 = vsub.f32 %v839_v37, %v862_v51 }
 0x3d9   : > { %v865_v54 = vmul.f32 %v1188_v38, %v863_v52  ;;  %v866_v55 = vmul.f32 %v1189_v35, %v864_v53 }
 0x3db   : > { %v867_v56 = vmul.f32 %v865_v54, %v865_v54  ;;  %v868_v57 = vmul.f32 %v866_v55, %v866_v55 }
 0x3dd   : > { %v869_v58 = vadd.f32 %v868_v57, %v867_v56 }
 0x3df   : > { %v870_v59 = vrot.slane %v869_v58, 4 }
 0x3e1   : > { %v871_v60 = vadd.f32 %v870_v59, %v869_v58 }
 0x3e3   : > { %v872_v61 = vrot.slane %v871_v60, 2 }
 0x3e5   : > { %v873_v62 = vadd.f32 %v872_v61, %v871_v60 }
 0x3e7   : > { %v874_v63 = vrot.slane %v873_v62, 1 }
 0x3e9   : > { %v875_v0 = vadd.f32 %v874_v63, %v873_v62 }
 0x3eb   : > { %v876_v1 = vmul.f32 %v1614_v49, %v875_v0 }
 0x3ed   : > { %v877_v2 = vadd.f32 1e-05, %v876_v1 }
 0x3ef   : > { %1615 = vrsqrt.f32 %v877_v2 }
 0x3f9   : > { %v1616_v3 = vpop.eup %1615 }
 0x3fa   : > { %v879_v5 = vmul.f32 %v1616_v3, %v863_v52  ;;  %v880_v6 = vmul.f32 %v1616_v3, %v864_v53 }
 0x3fc   : > { %v888_v8 = vmul.f32 %v1190_v4, %v879_v5  ;;  %v889_v9 = vmul.f32 %v1190_v4, %v880_v6 }
 0x3fe   : > { %v897_v10 = vadd.f32 %v1191_v7, %v888_v8  ;;  %v898_v11 = vadd.f32 %v1191_v7, %v889_v9 }
 0x400   : > { %1369 = vmatprep.mubr.f32.mxu1 %v897_v10 }
 0x401   : > { %1370 = vmatmul.mubr.f32.vlgmr.msra.gmra.mrb[0].mxu1 %v898_v11 }
 0x4d4   : > { %v1371_v13 = vpop.f32.mrb[0].mxu1 }
 0x4d5   : > { %v994_v14 = vadd.f32 %v1371_v13, %v1192_v12  ;;  %v988_v15 = vpop.f32.mrb[1].mxu1 }
 0x4d6   : > { %v989_v16 = vadd.f32 %v1192_v12, %v988_v15 }
 0x4d7   : > { %v998_v17 = vmax.f32 %v994_v14, 0.0 }
 0x4d8   : > { %v997_v18 = vmax.f32 %v989_v16, 0.0 }
 0x4d9   : > { %1000 = vst [vmem:[%s2449_s6 + $0x8] sm:$0xff] %v998_v17 }
 0x4da   : > { %999 = vst [vmem:[%s2449_s6] sm:$0xff] %v997_v18 }
 0x4db PF: > { %s2620_s10 = sld [smem:[#allocation30_spill]]  ;;  %s1016_s30 = sshll.u32 %s2449_s6, 4  ;;  %s2475_s30 = int_to_ptr.vmem [resolvable:$true] %s1016_s30 }
 0x4dc   : > { %s2622_s19 = sld [smem:[#allocation41_spill]]  ;;  %s2484_s16 = scalar_lea.sflag [#allocation11], %s522_s25 }
 0x4dd   : > { %s1821_s24 = scalar_lea.vmem %s2475_s30, 256 }
 0x4de   : > { %p1822_p2 = scmp.ne.s32.totalorder %s2475_s30, %s1821_s24 }
 0x4e1   : > { %p2621_p10 = scmp.ne.s32.totalorder %s2620_s10, 0 }
 0x4e2   : > { %s2623_s12 = smov %s2622_s19 }
 0x4e3   : > { %s1488_s11 = scalar_select %p2621_p10, [#allocation5], [#allocation20] }
 0x4e4   : > { %s2643_s22 = smov (!%p2621_p10, %s2118_s22), 0  ;;  %p1823_p13 = pnand %p1822_p2, %p2621_p10 }
 0x4e5   : > { %s1009_s4 = sld [smem:[%s1488_s11 + %s2643_s22]]  ;;  %s1964_s22 = smov [#allocation18]  }
 0x4e6   : > { %p1824_p4 = pneg %p1823_p13  ;;  %s1825_s6 = sshll.u32 %s1964_s22, 4  ;;  %s1826_s6 = int_to_ptr.vmem [resolvable:$false] %s1825_s6 }
 0x4e7   : > { %s1827_s3 = scalar_lea.vmem %s1826_s6, 512  ;;  %p1828_p8 = scmp.lt.s32.totalorder %s2475_s30, %s1826_s6 }
 0x4e8   : > { %p1829_p5 = scmp.lt.s32.totalorder %s1827_s3, %s1821_s24 }
 0x4ea   : > { %p1830_p0 = por %p1829_p5, %p1828_p8 }
 0x4eb   : > { %s1201_s13 = sshll.u32 %s1009_s4, 8 }
 0x4ec   : > { %s2480_s28 = scalar_lea.hbm %s2622_s19, %s1201_s13  ;;  %p1831_p6 = pnand %p1830_p0, %p1824_p4 }
 0x4ee   : > { %1834 = shalt.err (!%p1831_p6)
}
 0x4ef   : > { %s1835_s25 = scalar_lea.hbm %s2480_s28, 256  ;;  %s1839_s26 = scalar_lea.hbm %s2623_s12, 512 }
 0x4f0   : > { %p1836_p11 = scmp.ne.s32.totalorder %s2480_s28, %s1835_s25  ;;  %p1840_p1 = scmp.lt.u32.totalorder %s2480_s28, %s2623_s12 }
 0x4f1   : > { %p1841_p9 = scmp.lt.u32.totalorder %s1839_s26, %s1835_s25  ;;  %p1843_p2 = scmp.lt.u32.totalorder %s1835_s25, %s2480_s28 }
 0x4f2   : > { %p1837_p12 = pnand %p1836_p11, %p2621_p10 }
 0x4f3   : > { %p1842_p7 = por %p1841_p9, %p1840_p1 }
 0x4f4   : > { %p1838_p3 = pneg %p1837_p12 }
 0x4f5   : > { %p1844_p13 = por %p1843_p2, %p1842_p7 }
 0x4f7   : > { %p1845_p4 = pnand %p1844_p13, %p1838_p3 }
 0x4f9   : > { %1848 = shalt.err (!%p1845_p4)
}
 0x4fa   : > { %s1965_s4 = smov 128   ;;  %s1966_s13 = smov 8  }
 0x4fb   : > { %1490 = dma.vmem_to_hbm [thread:$0]  (%p2621_p10), %s2475_s30, 256, %s2480_s28, %s2484_s16, %s1965_s4, %s1965_s4, %s1966_s13  }
 0x4fc PF: > { %s2624_s8 = sld [smem:[#allocation28_spill]]  ;;  %s2625_s14 = sld [smem:[#allocation31_spill]] }
 0x4fd   : > { %p1520_p8 = scmp.ge.s32.totalorder %s1949_s21, 2 }
 0x502   : > { %s1031_s19 = sand.u32 1, %s2624_s8   ;;  %p2626_p5 = scmp.ne.s32.totalorder %s2625_s14, 0 }
 0x503   : > { %s1032_s24 = scalar_lea.sflag [#allocation11], %s1031_s19 }
 0x504   : > { %p1512_p0 = pnand %p1520_p8, %p2626_p5 }
 0x506   : > { %1908 = dma.done.wait (!%p1512_p0), %s1032_s24, 256  }
 0x507   : > { %1910 = vsyncadd (!%p1512_p0), %s1032_s24, 4294967040  ;;  %s2627_s22 = sld [smem:[#allocation29_spill]]  ;;  %s2628_s30 = sld [smem:[#allocation32_spill]] }
 0x508   : > { %p52_p10 = scmp.ge.s32.totalorder %s2122_s2, 5   ;;  %s2629_s4 = smov %s1917_s29 }
 0x509   : > { %s2631_s16 = smov %s1929_s17  ;;  %s2632_s17 = smov %s1933_s18 }
 0x50a   : > { %s2633_s18 = smov %s2217_s27  ;;  %s2634_s19 = smov %s1941_s20 }
 0x50b   : > { %s2635_s20 = smov %s1945_s0  ;;  %s2636_s0 = smov %s2253_s1 }
 0x50c   : > { %s2637_s21 = smov %s2122_s2  ;;  %54 = sbr.rel (!%p52_p10) target bundleno = 68 (0x44), region = 152 }
 0x50d   : > { %s2630_s29 = smov %s2627_s22 }
 0x513   :  { %1037 = vsyncpa [#allocation10], 1 }
 0x514   :  { %1039 = vsyncpa [#allocation10 + $0x1], 1 }
 0x515   :  { %1040 = vsyncpa [#allocation13], 1 }
 0x516   :  { %1042 = vsyncpa [#allocation13 + $0x1], 1 }
 0x517   :  { %1043 = vsyncpa [#allocation16], 1 }
 0x518   :  { %1044 = vsyncpa [#allocation11], 1 }
 0x519   :  { %1046 = vsyncpa [#allocation11 + $0x1], 1 }

</bundles_post_ra>
